<compile_context>
chip_gen: v7x
topology: tpu7x:2x2x1
jax: 0.10.0
libtpu: 0.0.40
codegen_flags: <defaults>
</compile_context>

<pallas_src>
import functools

import jax
import jax.numpy as jnp
from jax import lax
from jax.experimental import pallas as pl
from jax.experimental.pallas import tpu as pltpu


# ----------------------------------------------------------------------------
# small helpers
# ----------------------------------------------------------------------------

def _largest_divisor_le(n, target, multiple_of=1):
    """Largest divisor of n that is <= target and a multiple of `multiple_of`.
    Falls back to n (full dimension) if none exists."""
    hi = min(n, target)
    for c in range(hi, 0, -1):
        if n % c == 0 and c % multiple_of == 0:
            return c
    return n


def _pick_heads_per_group(num_heads, head_dim, target_cols=256):
    """Largest head-group size G dividing num_heads with G*head_dim <= target."""
    best = 1
    for g in range(1, num_heads + 1):
        if num_heads % g == 0 and g * head_dim <= target_cols:
            best = g
    return best


def _vmem_limit_bytes(frac=0.85):
    """Generation-aware VMEM budget (leave headroom for Mosaic scratch)."""
    cap = 128 * 1024 * 1024
    try:
        info = pltpu.get_tpu_info()
        cap = int(getattr(info, "vmem_capacity_bytes", cap) or cap)
    except Exception:
        pass
    return max(32 * 1024 * 1024, min(int(cap * frac), 112 * 1024 * 1024))


# ----------------------------------------------------------------------------
# kernel 1: LN1 + self-attention + residual, grid = (B, head_groups)
# ----------------------------------------------------------------------------

def _attn_kernel(x_ref,       # (1, T, E)  f32  hidden_states (also residual)
                 wqkv_ref,    # (1, E, 3*G*D) bf16 fused q|k|v weights for this group
                 bqkv_ref,    # (1, 1, 3*G*D) f32  fused biases (q already scaled)
                 wo_ref,      # (1, G*D, E) bf16   out_proj rows for this group
                 bo_ref,      # (1, E) f32
                 g1_ref, b1_ref,   # (1, E) f32 LN1 affine
                 out_ref,     # (1, T, E) f32  resident accumulator over groups
                 xln_ref,     # scratch (T, E) bf16: LN1(x)
                 ctx_ref,     # scratch (T, G*D) bf16: per-group attention context
                 *, heads_per_group, head_dim, ln_eps):
    f32 = jnp.float32
    bf16 = jnp.bfloat16
    g = pl.program_id(1)

    @pl.when(g == 0)
    def _init():
        x = x_ref[0]
        mu = jnp.mean(x, axis=-1, keepdims=True)
        var = jnp.mean(jnp.square(x - mu), axis=-1, keepdims=True)
        xhat = (x - mu) * lax.rsqrt(var + ln_eps)
        xln_ref[...] = (xhat * g1_ref[...] + b1_ref[...]).astype(bf16)
        # residual + out_proj bias; head groups accumulate their contribution below.
        out_ref[0] = x + bo_ref[...]

    xln = xln_ref[...]                                    # (T, E) bf16

    # One wide projection matmul for the whole head group: N = 3*G*D.
    qkv = jnp.dot(xln, wqkv_ref[0], preferred_element_type=f32) + bqkv_ref[0]

    gd = heads_per_group * head_dim
    t = qkv.shape[0]
    q_all = qkv[:, 0:gd]
    k_all = qkv[:, gd:2 * gd]
    v_all = qkv[:, 2 * gd:3 * gd]

    # Causal mask generated in-kernel (no (B,1,T,T) f32 stream from HBM).
    row = lax.broadcasted_iota(jnp.int32, (t, t), 0)
    col = lax.broadcasted_iota(jnp.int32, (t, t), 1)
    causal = col <= row
    neg = jnp.finfo(f32).min

    for h in range(heads_per_group):                      # small, unrolled
        sl = slice(h * head_dim, (h + 1) * head_dim)
        q = q_all[:, sl].astype(bf16)                     # scaling folded into weights
        k = k_all[:, sl].astype(bf16)
        v = v_all[:, sl].astype(bf16)

        # scores = q @ k.T without materializing a transpose.
        s = lax.dot_general(q, k, dimension_numbers=(((1,), (1,)), ((), ())),
                            preferred_element_type=f32)   # (T, T) f32
        # Mask folded into a single select; diagonal always unmasked -> m finite.
        s = jnp.where(causal, s, neg)

        m = jnp.max(s, axis=-1, keepdims=True)
        p = jnp.exp(s - m)
        l = jnp.sum(p, axis=-1, keepdims=True)

        ctx = jnp.dot(p.astype(bf16), v, preferred_element_type=f32)  # (T, D)
        ctx = ctx * pl.reciprocal(l, approx=True)          # deferred normalization
        ctx_ref[:, sl] = ctx.astype(bf16)

    # One wide out_proj matmul per group (K = G*D), accumulated into the
    # resident output block.
    out_ref[0] += jnp.dot(ctx_ref[...], wo_ref[0], preferred_element_type=f32)


# ----------------------------------------------------------------------------
# kernel 2: LN2 + fc1 + ReLU + fc2 + residual, grid = (row_tiles, ffn_chunks)
# ----------------------------------------------------------------------------

def _mlp_kernel(hid_ref,      # (tm, E) f32  attention output (residual)
                g2_ref, b2_ref,    # (1, E) f32 LN2 affine
                wf1_ref,      # (E, tf) bf16  fc1 chunk
                bf1_ref,      # (1, tf) f32
                wf2_ref,      # (tf, E) bf16  fc2 chunk
                bf2_ref,      # (1, E) f32
                out_ref,      # (tm, E) f32  resident accumulator over ffn chunks
                hln_ref,      # scratch (tm, E) bf16: LN2(hid)
                *, ln_eps):
    f32 = jnp.float32
    bf16 = jnp.bfloat16
    j = pl.program_id(1)

    @pl.when(j == 0)
    def _init():
        hid = hid_ref[...]
        mu = jnp.mean(hid, axis=-1, keepdims=True)
        var = jnp.mean(jnp.square(hid - mu), axis=-1, keepdims=True)
        hln = (hid - mu) * lax.rsqrt(var + ln_eps) * g2_ref[...] + b2_ref[...]
        hln_ref[...] = hln.astype(bf16)
        out_ref[...] = hid + bf2_ref[...]       # residual + fc2 bias

    a = jnp.dot(hln_ref[...], wf1_ref[...], preferred_element_type=f32) + bf1_ref[...]
    a = jnp.maximum(a, 0.0)                      # ReLU (OPT activation_function)
    out_ref[...] += jnp.dot(a.astype(bf16), wf2_ref[...], preferred_element_type=f32)


# ----------------------------------------------------------------------------
# wrappers
# ----------------------------------------------------------------------------

def pack_opt_decoder_layer_params(params, num_heads, heads_per_group=None):
    """One-time weight packing (call at model init, NOT per layer call).

    params: PyTorch-layout tensors
      (wq, bq, wk, bk, wv, bv, wo, bo, ln1_g, ln1_b, ln2_g, ln2_b,
       wfc1, bfc1, wfc2, bfc2) with Linear weights shaped (out, in).
    """
    (wq, bq, wk, bk, wv, bv, wo, bo,
     g1, b1, g2, b2, wf1, bf1, wf2, bf2) = params
    E = wq.shape[0]
    D = E // num_heads
    assert D * num_heads == E
    if heads_per_group is None:
        heads_per_group = _pick_heads_per_group(num_heads, D)
    assert num_heads % heads_per_group == 0
    ng = num_heads // heads_per_group
    gd = heads_per_group * D
    F = wf1.shape[0]
    bf16 = jnp.bfloat16
    f32 = jnp.float32
    scaling = D ** -0.5

    def per_group_t(w):   # (E_out, E_in) torch layout -> (NG, E, G*D)
        return w.reshape(ng, gd, E).transpose(0, 2, 1)

    # Fold attention scaling into q weights/bias; fuse q|k|v per head group.
    wqkv = jnp.concatenate(
        [per_group_t(wq * scaling), per_group_t(wk), per_group_t(wv)],
        axis=-1).astype(bf16)                                   # (NG, E, 3*G*D)
    bqkv = jnp.concatenate(
        [(bq * scaling).reshape(ng, 1, gd),
         bk.reshape(ng, 1, gd),
         bv.reshape(ng, 1, gd)], axis=-1).astype(f32)           # (NG, 1, 3*G*D)
    wo3 = wo.T.reshape(ng, gd, E).astype(bf16)                  # (NG, G*D, E)

    return dict(
        wqkv=wqkv, bqkv=bqkv, wo=wo3,
        bo=bo.reshape(1, E).astype(f32),
        ln1_g=g1.reshape(1, E).astype(f32), ln1_b=b1.reshape(1, E).astype(f32),
        ln2_g=g2.reshape(1, E).astype(f32), ln2_b=b2.reshape(1, E).astype(f32),
        wf1=wf1.T.astype(bf16), bf1=bf1.reshape(1, F).astype(f32),
        wf2=wf2.T.astype(bf16), bf2=bf2.reshape(1, E).astype(f32),
        num_heads=num_heads, heads_per_group=heads_per_group, head_dim=D,
        embed_dim=E, ffn_dim=F,
    )


def _attention_block(x, p, *, ln_eps):
    B, T, E = x.shape
    G = p["heads_per_group"]
    D = p["head_dim"]
    ng = p["num_heads"] // G
    gd = G * D
    kernel = functools.partial(_attn_kernel, heads_per_group=G, head_dim=D,
                               ln_eps=ln_eps)
    return pl.pallas_call(
        kernel,
        out_shape=jax.ShapeDtypeStruct((B, T, E), jnp.float32),
        grid_spec=pltpu.PrefetchScalarGridSpec(
            num_scalar_prefetch=0,
            grid=(B, ng),
            in_specs=[
                pl.BlockSpec((1, T, E), lambda b, g: (b, 0, 0)),        # x
                pl.BlockSpec((1, E, 3 * gd), lambda b, g: (g, 0, 0)),   # wqkv
                pl.BlockSpec((1, 1, 3 * gd), lambda b, g: (g, 0, 0)),   # bqkv
                pl.BlockSpec((1, gd, E), lambda b, g: (g, 0, 0)),       # out_proj W
                pl.BlockSpec((1, E), lambda b, g: (0, 0)),              # out_proj b
                pl.BlockSpec((1, E), lambda b, g: (0, 0)),              # LN1 gamma
                pl.BlockSpec((1, E), lambda b, g: (0, 0)),              # LN1 beta
            ],
            out_specs=pl.BlockSpec((1, T, E), lambda b, g: (b, 0, 0)),
            scratch_shapes=[pltpu.VMEM((T, E), jnp.bfloat16),
                            pltpu.VMEM((T, gd), jnp.bfloat16)],
        ),
        compiler_params=pltpu.CompilerParams(
            dimension_semantics=("parallel", "arbitrary"),
            vmem_limit_bytes=_vmem_limit_bytes(),
        ),
    )(x, p["wqkv"], p["bqkv"], p["wo"], p["bo"], p["ln1_g"], p["ln1_b"])


def _mlp_block(hid2d, p, *, ln_eps):
    M, E = hid2d.shape
    F = p["ffn_dim"]
    tm = _largest_divisor_le(M, 256, 8)      # row tile (second-minor: mult of 8)
    tf = _largest_divisor_le(F, 512, 128)    # ffn chunk (minor: mult of 128)
    kernel = functools.partial(_mlp_kernel, ln_eps=ln_eps)
    return pl.pallas_call(
        kernel,
        out_shape=jax.ShapeDtypeStruct((M, E), jnp.float32),
        grid_spec=pltpu.PrefetchScalarGridSpec(
            num_scalar_prefetch=0,
            grid=(M // tm, F // tf),
            in_specs=[
                pl.BlockSpec((tm, E), lambda i, j: (i, 0)),     # attention output
                pl.BlockSpec((1, E), lambda i, j: (0, 0)),      # LN2 gamma
                pl.BlockSpec((1, E), lambda i, j: (0, 0)),      # LN2 beta
                pl.BlockSpec((E, tf), lambda i, j: (0, j)),     # fc1 W chunk
                pl.BlockSpec((1, tf), lambda i, j: (0, j)),     # fc1 b chunk
                pl.BlockSpec((tf, E), lambda i, j: (j, 0)),     # fc2 W chunk
                pl.BlockSpec((1, E), lambda i, j: (0, 0)),      # fc2 b
            ],
            out_specs=pl.BlockSpec((tm, E), lambda i, j: (i, 0)),
            scratch_shapes=[pltpu.VMEM((tm, E), jnp.bfloat16)],
        ),
        compiler_params=pltpu.CompilerParams(
            dimension_semantics=("parallel", "arbitrary"),
            vmem_limit_bytes=_vmem_limit_bytes(),
        ),
    )(hid2d, p["ln2_g"], p["ln2_b"], p["wf1"], p["bf1"], p["wf2"], p["bf2"])


def opt_decoder_layer(hidden_states, packed_params, *, ln_eps=1e-5):
    """hidden_states: (B, T, E) f32. packed_params: output of
    pack_opt_decoder_layer_params (packed once at init)."""
    B, T, E = hidden_states.shape
    attn_out = _attention_block(hidden_states, packed_params, ln_eps=ln_eps)
    mlp_out = _mlp_block(attn_out.reshape(B * T, E), packed_params, ln_eps=ln_eps)
    return mlp_out.reshape(B, T, E)


# ----------------------------------------------------------------------------
# plain-JAX reference (mirrors the PyTorch forward, eval mode, causal mask)
# ----------------------------------------------------------------------------

def _reference(x, params, num_heads, ln_eps=1e-5):
    (wq, bq, wk, bk, wv, bv, wo, bo,
     g1, b1, g2, b2, wf1, bf1, wf2, bf2) = params
    B, T, E = x.shape
    D = E // num_heads
    scaling = D ** -0.5

    def ln(h, g, b):
        mu = h.mean(axis=-1, keepdims=True)
        var = jnp.mean(jnp.square(h - mu), axis=-1, keepdims=True)
        return (h - mu) / jnp.sqrt(var + ln_eps) * g + b

    neg = jnp.finfo(jnp.float32).min
    causal = jnp.where(jnp.tril(jnp.ones((T, T), dtype=bool)), 0.0, neg)
    mask = jnp.broadcast_to(causal[None, None], (B, 1, T, T)).astype(jnp.float32)

    residual = x
    h = ln(x, g1, b1)
    q = (h @ wq.T + bq) * scaling
    k = h @ wk.T + bk
    v = h @ wv.T + bv

    def split(t):
        return t.reshape(B, T, num_heads, D).transpose(0, 2, 1, 3)

    q, k, v = split(q), split(k), split(v)
    s = jnp.einsum("bhtd,bhsd->bhts", q, k) + mask
    s = jnp.maximum(s, neg)
    p = jax.nn.softmax(s, axis=-1)
    ctx = jnp.einsum("bhts,bhsd->bhtd", p, v)
    ctx = ctx.transpose(0, 2, 1, 3).reshape(B, T, E)
    h = residual + (ctx @ wo.T + bo)

    residual2 = h
    h2 = ln(h, g2, b2)
    a = jnp.maximum(h2 @ wf1.T + bf1, 0.0)
    return residual2 + (a @ wf2.T + bf2)


# ----------------------------------------------------------------------------
# demo / correctness check
# ----------------------------------------------------------------------------

if __name__ == "__main__":
    B, T, E, H = 2, 8, 32, 4
    F = 4 * E

    key = jax.random.PRNGKey(0)
    ks = jax.random.split(key, 18)

    x = jax.random.normal(ks[0], (B, T, E), dtype=jnp.float32)

    def mkw(k, o, i):
        return 0.02 * jax.random.normal(k, (o, i), dtype=jnp.float32)

    def mkb(k, n):
        return 0.01 * jax.random.normal(k, (n,), dtype=jnp.float32)

    params = (
        mkw(ks[1], E, E), mkb(ks[2], E),      # q_proj
        mkw(ks[3], E, E), mkb(ks[4], E),      # k_proj
        mkw(ks[5], E, E), mkb(ks[6], E),      # v_proj
        mkw(ks[7], E, E), mkb(ks[8], E),      # out_proj
        1.0 + 0.05 * jax.random.normal(ks[9], (E,), dtype=jnp.float32),   # LN1 gamma
        0.01 * jax.random.normal(ks[10], (E,), dtype=jnp.float32),        # LN1 beta
        1.0 + 0.05 * jax.random.normal(ks[11], (E,), dtype=jnp.float32),  # LN2 gamma
        0.01 * jax.random.normal(ks[12], (E,), dtype=jnp.float32),        # LN2 beta
        mkw(ks[13], F, E), mkb(ks[14], F),    # fc1
        mkw(ks[15], E, F), mkb(ks[16], E),    # fc2
    )

    # Pack weights ONCE (hoisted out of the per-call path).
    packed = pack_opt_decoder_layer_params(params, num_heads=H)

    out = opt_decoder_layer(x, packed)
    out = jax.block_until_ready(out)

    ref = _reference(x, params, H)
    assert out.shape == (B, T, E)
    err = float(jnp.max(jnp.abs(out - ref)))
    # bf16 matmul operands + approx reciprocal -> looser tolerance than pure f32.
    assert err < 3e-2, f"mismatch vs reference: max abs err {err}"

    print("KERNEL_OK")
</pallas_src>

<mosaic_0001>
module attributes {stable_mosaic.version = 11 : i64} {
  func.func @_attn_kernel(%arg0: i32, %arg1: i32, %arg2: memref<1x8x32xf32, #tpu.memory_space<vmem>>, %arg3: memref<1x32x96xbf16, #tpu.memory_space<vmem>>, %arg4: memref<1x1x96xf32, #tpu.memory_space<vmem>>, %arg5: memref<1x32x32xbf16, #tpu.memory_space<vmem>>, %arg6: memref<1x32xf32, #tpu.memory_space<vmem>>, %arg7: memref<1x32xf32, #tpu.memory_space<vmem>>, %arg8: memref<1x32xf32, #tpu.memory_space<vmem>>, %arg9: memref<1x8x32xf32, #tpu.memory_space<vmem>>, %arg10: memref<8x32xbf16, #tpu.memory_space<vmem>>, %arg11: memref<8x32xbf16, #tpu.memory_space<vmem>>) attributes {dimension_semantics = [#tpu.dimension_semantics<parallel>, #tpu.dimension_semantics<arbitrary>], iteration_bounds = array<i64: 2, 1>, scalar_prefetch = 0 : i64, scratch_operands = 2 : i64, tpu.core_type = #tpu.core_type<tc>, window_params = [{transform_indices = @transform_0, window_bounds = array<i64: 1, 8, 32>}, {transform_indices = @transform_1, window_bounds = array<i64: 1, 32, 96>}, {transform_indices = @transform_2, window_bounds = array<i64: 1, 1, 96>}, {transform_indices = @transform_3, window_bounds = array<i64: 1, 32, 32>}, {pipeline_mode = #tpu.pipeline_mode<synchronous>, transform_indices = @transform_4, window_bounds = array<i64: 1, 32>}, {pipeline_mode = #tpu.pipeline_mode<synchronous>, transform_indices = @transform_5, window_bounds = array<i64: 1, 32>}, {pipeline_mode = #tpu.pipeline_mode<synchronous>, transform_indices = @transform_6, window_bounds = array<i64: 1, 32>}, {transform_indices = @transform_7, window_bounds = array<i64: 1, 8, 32>}]} {
    %c0_i32 = arith.constant 0 : i32
    %0 = arith.cmpi eq, %arg1, %c0_i32 : i32
    %1 = arith.extui %0 : i1 to i32
    %c0_i32_0 = arith.constant 0 : i32
    %2 = arith.cmpi ne, %1, %c0_i32_0 : i32
    scf.if %2 {
      %c0_45 = arith.constant 0 : index
      %c0_46 = arith.constant 0 : index
      %c0_47 = arith.constant 0 : index
      %119 = vector.load %arg2[%c0_45, %c0_46, %c0_47] : memref<1x8x32xf32, #tpu.memory_space<vmem>>, vector<1x8x32xf32>
      %120 = vector.shape_cast %119 : vector<1x8x32xf32> to vector<8x32xf32>
      %cst_48 = arith.constant dense<0.000000e+00> : vector<8xf32>
      %121 = vector.multi_reduction <add>, %120, %cst_48 [1] : vector<8x32xf32> to vector<8xf32>
      %122 = vector.shape_cast %121 : vector<8xf32> to vector<8x1xf32>
      %cst_49 = arith.constant 3.200000e+01 : f32
      %123 = vector.broadcast %cst_49 : f32 to vector<8x1xf32>
      %124 = arith.divf %122, %123 : vector<8x1xf32>
      %125 = vector.broadcast %124 : vector<8x1xf32> to vector<8x32xf32>
      %126 = arith.subf %120, %125 : vector<8x32xf32>
      %127 = arith.mulf %126, %126 : vector<8x32xf32>
      %cst_50 = arith.constant dense<0.000000e+00> : vector<8xf32>
      %128 = vector.multi_reduction <add>, %127, %cst_50 [1] : vector<8x32xf32> to vector<8xf32>
      %129 = vector.shape_cast %128 : vector<8xf32> to vector<8x1xf32>
      %cst_51 = arith.constant 3.200000e+01 : f32
      %130 = vector.broadcast %cst_51 : f32 to vector<8x1xf32>
      %131 = arith.divf %129, %130 : vector<8x1xf32>
      %132 = vector.broadcast %124 : vector<8x1xf32> to vector<8x32xf32>
      %133 = arith.subf %120, %132 : vector<8x32xf32>
      %cst_52 = arith.constant 9.99999974E-6 : f32
      %134 = vector.broadcast %cst_52 : f32 to vector<8x1xf32>
      %135 = arith.addf %131, %134 : vector<8x1xf32>
      %136 = math.rsqrt %135 : vector<8x1xf32>
      %137 = vector.broadcast %136 : vector<8x1xf32> to vector<8x32xf32>
      %138 = arith.mulf %133, %137 : vector<8x32xf32>
      %c0_53 = arith.constant 0 : index
      %c0_54 = arith.constant 0 : index
      %139 = vector.load %arg7[%c0_53, %c0_54] : memref<1x32xf32, #tpu.memory_space<vmem>>, vector<1x32xf32>
      %140 = vector.broadcast %139 : vector<1x32xf32> to vector<8x32xf32>
      %141 = arith.mulf %138, %140 : vector<8x32xf32>
      %c0_55 = arith.constant 0 : index
      %c0_56 = arith.constant 0 : index
      %142 = vector.load %arg8[%c0_55, %c0_56] : memref<1x32xf32, #tpu.memory_space<vmem>>, vector<1x32xf32>
      %143 = vector.broadcast %142 : vector<1x32xf32> to vector<8x32xf32>
      %144 = arith.addf %141, %143 : vector<8x32xf32>
      %145 = arith.truncf %144 : vector<8x32xf32> to vector<8x32xbf16>
      %c0_57 = arith.constant 0 : index
      %c0_58 = arith.constant 0 : index
      %146 = vector.load %arg10[%c0_57, %c0_58] : memref<8x32xbf16, #tpu.memory_space<vmem>>, vector<8x32xbf16>
      tpu.vector_store %arg10[%c0_57, %c0_58], %145 {strides = array<i32>} : memref<8x32xbf16, #tpu.memory_space<vmem>>, vector<8x32xbf16>,
      %c0_59 = arith.constant 0 : index
      %c0_60 = arith.constant 0 : index
      %147 = vector.load %arg6[%c0_59, %c0_60] : memref<1x32xf32, #tpu.memory_space<vmem>>, vector<1x32xf32>
      %148 = vector.broadcast %147 : vector<1x32xf32> to vector<8x32xf32>
      %149 = arith.addf %120, %148 : vector<8x32xf32>
      %c0_61 = arith.constant 0 : index
      %c0_62 = arith.constant 0 : index
      %c0_63 = arith.constant 0 : index
      %150 = vector.load %arg9[%c0_61, %c0_62, %c0_63] : memref<1x8x32xf32, #tpu.memory_space<vmem>>, vector<1x8x32xf32>
      %151 = vector.shape_cast %150 : vector<1x8x32xf32> to vector<8x32xf32>
      %152 = vector.shape_cast %149 : vector<8x32xf32> to vector<1x8x32xf32>
      tpu.vector_store %arg9[%c0_61, %c0_62, %c0_63], %152 {strides = array<i32>} : memref<1x8x32xf32, #tpu.memory_space<vmem>>, vector<1x8x32xf32>,
    } else {
    }
    %c0 = arith.constant 0 : index
    %c0_1 = arith.constant 0 : index
    %3 = vector.load %arg10[%c0, %c0_1] : memref<8x32xbf16, #tpu.memory_space<vmem>>, vector<8x32xbf16>
    %c0_2 = arith.constant 0 : index
    %c0_3 = arith.constant 0 : index
    %c0_4 = arith.constant 0 : index
    %4 = vector.load %arg3[%c0_2, %c0_3, %c0_4] : memref<1x32x96xbf16, #tpu.memory_space<vmem>>, vector<1x32x96xbf16>
    %5 = vector.shape_cast %4 : vector<1x32x96xbf16> to vector<32x96xbf16>
    %cst = arith.constant dense<0.000000e+00> : vector<8x96xf32>
    %6 = tpu.matmul %3, %5, %cst {dimension_numbers = #tpu.dot_dimension_numbers<[1], [0], [0], [1], [0, 0, 1, 1], [], []>} : vector<8x32xbf16>, vector<32x96xbf16>, vector<8x96xf32> -> vector<8x96xf32>
    %c0_5 = arith.constant 0 : index
    %c0_6 = arith.constant 0 : index
    %c0_7 = arith.constant 0 : index
    %7 = vector.load %arg4[%c0_5, %c0_6, %c0_7] : memref<1x1x96xf32, #tpu.memory_space<vmem>>, vector<1x1x96xf32>
    %8 = vector.shape_cast %7 : vector<1x1x96xf32> to vector<1x96xf32>
    %9 = vector.broadcast %8 : vector<1x96xf32> to vector<8x96xf32>
    %10 = arith.addf %6, %9 : vector<8x96xf32>
    %11 = vector.extract_strided_slice %10 {offsets = [0, 0], sizes = [8, 32], strides = [1, 1]} : vector<8x96xf32> to vector<8x32xf32>
    %12 = vector.extract_strided_slice %10 {offsets = [0, 32], sizes = [8, 32], strides = [1, 1]} : vector<8x96xf32> to vector<8x32xf32>
    %13 = vector.extract_strided_slice %10 {offsets = [0, 64], sizes = [8, 32], strides = [1, 1]} : vector<8x96xf32> to vector<8x32xf32>
    %14 = tpu.iota {dimensions = array<i32: 0>} : vector<8x8xi32>
    %15 = tpu.iota {dimensions = array<i32: 1>} : vector<8x8xi32>
    %16 = arith.cmpi sle, %15, %14 : vector<8x8xi32>
    %17 = vector.extract_strided_slice %11 {offsets = [0, 0], sizes = [8, 8], strides = [1, 1]} : vector<8x32xf32> to vector<8x8xf32>
    %18 = arith.truncf %17 : vector<8x8xf32> to vector<8x8xbf16>
    %19 = vector.extract_strided_slice %12 {offsets = [0, 0], sizes = [8, 8], strides = [1, 1]} : vector<8x32xf32> to vector<8x8xf32>
    %20 = arith.truncf %19 : vector<8x8xf32> to vector<8x8xbf16>
    %21 = vector.extract_strided_slice %13 {offsets = [0, 0], sizes = [8, 8], strides = [1, 1]} : vector<8x32xf32> to vector<8x8xf32>
    %22 = arith.truncf %21 : vector<8x8xf32> to vector<8x8xbf16>
    %cst_8 = arith.constant dense<0.000000e+00> : vector<8x8xf32>
    %23 = tpu.matmul %18, %20, %cst_8 {dimension_numbers = #tpu.dot_dimension_numbers<[1], [1], [0], [0], [0, 0, 1, 0], [], []>} : vector<8x8xbf16>, vector<8x8xbf16>, vector<8x8xf32> -> vector<8x8xf32>
    %cst_9 = arith.constant -3.40282347E+38 : f32
    %24 = vector.broadcast %cst_9 : f32 to vector<8x8xf32>
    %25 = arith.select %16, %23, %24 : vector<8x8xi1>, vector<8x8xf32>
    %cst_10 = arith.constant dense<0xFF800000> : vector<8xf32>
    %26 = vector.multi_reduction <maximumf>, %25, %cst_10 [1] : vector<8x8xf32> to vector<8xf32>
    %27 = vector.shape_cast %26 : vector<8xf32> to vector<8x1xf32>
    %28 = vector.broadcast %27 : vector<8x1xf32> to vector<8x8xf32>
    %29 = arith.subf %25, %28 : vector<8x8xf32>
    %30 = math.exp %29 : vector<8x8xf32>
    %cst_11 = arith.constant dense<0.000000e+00> : vector<8xf32>
    %31 = vector.multi_reduction <add>, %30, %cst_11 [1] : vector<8x8xf32> to vector<8xf32>
    %32 = vector.shape_cast %31 : vector<8xf32> to vector<8x1xf32>
    %33 = arith.truncf %30 : vector<8x8xf32> to vector<8x8xbf16>
    %cst_12 = arith.constant dense<0.000000e+00> : vector<8x8xf32>
    %34 = tpu.matmul %33, %22, %cst_12 {dimension_numbers = #tpu.dot_dimension_numbers<[1], [0], [0], [1], [0, 0, 1, 1], [], []>} : vector<8x8xbf16>, vector<8x8xbf16>, vector<8x8xf32> -> vector<8x8xf32>
    %35 = tpu.reciprocal %32 {approx = true} : vector<8x1xf32> -> vector<8x1xf32>
    %36 = vector.broadcast %35 : vector<8x1xf32> to vector<8x8xf32>
    %37 = arith.mulf %34, %36 : vector<8x8xf32>
    %38 = arith.truncf %37 : vector<8x8xf32> to vector<8x8xbf16>
    %c0_13 = arith.constant 0 : index
    %c0_14 = arith.constant 0 : index
    %39 = vector.load %arg11[%c0_13, %c0_14] : memref<8x32xbf16, #tpu.memory_space<vmem>>, vector<8x8xbf16>
    tpu.vector_store %arg11[%c0_13, %c0_14], %38 {strides = array<i32>} : memref<8x32xbf16, #tpu.memory_space<vmem>>, vector<8x8xbf16>,
    %40 = vector.extract_strided_slice %11 {offsets = [0, 8], sizes = [8, 8], strides = [1, 1]} : vector<8x32xf32> to vector<8x8xf32>
    %41 = arith.truncf %40 : vector<8x8xf32> to vector<8x8xbf16>
    %42 = vector.extract_strided_slice %12 {offsets = [0, 8], sizes = [8, 8], strides = [1, 1]} : vector<8x32xf32> to vector<8x8xf32>
    %43 = arith.truncf %42 : vector<8x8xf32> to vector<8x8xbf16>
    %44 = vector.extract_strided_slice %13 {offsets = [0, 8], sizes = [8, 8], strides = [1, 1]} : vector<8x32xf32> to vector<8x8xf32>
    %45 = arith.truncf %44 : vector<8x8xf32> to vector<8x8xbf16>
    %cst_15 = arith.constant dense<0.000000e+00> : vector<8x8xf32>
    %46 = tpu.matmul %41, %43, %cst_15 {dimension_numbers = #tpu.dot_dimension_numbers<[1], [1], [0], [0], [0, 0, 1, 0], [], []>} : vector<8x8xbf16>, vector<8x8xbf16>, vector<8x8xf32> -> vector<8x8xf32>
    %cst_16 = arith.constant -3.40282347E+38 : f32
    %47 = vector.broadcast %cst_16 : f32 to vector<8x8xf32>
    %48 = arith.select %16, %46, %47 : vector<8x8xi1>, vector<8x8xf32>
    %cst_17 = arith.constant dense<0xFF800000> : vector<8xf32>
    %49 = vector.multi_reduction <maximumf>, %48, %cst_17 [1] : vector<8x8xf32> to vector<8xf32>
    %50 = vector.shape_cast %49 : vector<8xf32> to vector<8x1xf32>
    %51 = vector.broadcast %50 : vector<8x1xf32> to vector<8x8xf32>
    %52 = arith.subf %48, %51 : vector<8x8xf32>
    %53 = math.exp %52 : vector<8x8xf32>
    %cst_18 = arith.constant dense<0.000000e+00> : vector<8xf32>
    %54 = vector.multi_reduction <add>, %53, %cst_18 [1] : vector<8x8xf32> to vector<8xf32>
    %55 = vector.shape_cast %54 : vector<8xf32> to vector<8x1xf32>
    %56 = arith.truncf %53 : vector<8x8xf32> to vector<8x8xbf16>
    %cst_19 = arith.constant dense<0.000000e+00> : vector<8x8xf32>
    %57 = tpu.matmul %56, %45, %cst_19 {dimension_numbers = #tpu.dot_dimension_numbers<[1], [0], [0], [1], [0, 0, 1, 1], [], []>} : vector<8x8xbf16>, vector<8x8xbf16>, vector<8x8xf32> -> vector<8x8xf32>
    %58 = tpu.reciprocal %55 {approx = true} : vector<8x1xf32> -> vector<8x1xf32>
    %59 = vector.broadcast %58 : vector<8x1xf32> to vector<8x8xf32>
    %60 = arith.mulf %57, %59 : vector<8x8xf32>
    %61 = arith.truncf %60 : vector<8x8xf32> to vector<8x8xbf16>
    %c0_20 = arith.constant 0 : index
    %c8 = arith.constant 8 : index
    %62 = vector.load %arg11[%c0_20, %c8] : memref<8x32xbf16, #tpu.memory_space<vmem>>, vector<8x8xbf16>
    tpu.vector_store %arg11[%c0_20, %c8], %61 {strides = array<i32>} : memref<8x32xbf16, #tpu.memory_space<vmem>>, vector<8x8xbf16>,
    %63 = vector.extract_strided_slice %11 {offsets = [0, 16], sizes = [8, 8], strides = [1, 1]} : vector<8x32xf32> to vector<8x8xf32>
    %64 = arith.truncf %63 : vector<8x8xf32> to vector<8x8xbf16>
    %65 = vector.extract_strided_slice %12 {offsets = [0, 16], sizes = [8, 8], strides = [1, 1]} : vector<8x32xf32> to vector<8x8xf32>
    %66 = arith.truncf %65 : vector<8x8xf32> to vector<8x8xbf16>
    %67 = vector.extract_strided_slice %13 {offsets = [0, 16], sizes = [8, 8], strides = [1, 1]} : vector<8x32xf32> to vector<8x8xf32>
    %68 = arith.truncf %67 : vector<8x8xf32> to vector<8x8xbf16>
    %cst_21 = arith.constant dense<0.000000e+00> : vector<8x8xf32>
    %69 = tpu.matmul %64, %66, %cst_21 {dimension_numbers = #tpu.dot_dimension_numbers<[1], [1], [0], [0], [0, 0, 1, 0], [], []>} : vector<8x8xbf16>, vector<8x8xbf16>, vector<8x8xf32> -> vector<8x8xf32>
    %cst_22 = arith.constant -3.40282347E+38 : f32
    %70 = vector.broadcast %cst_22 : f32 to vector<8x8xf32>
    %71 = arith.select %16, %69, %70 : vector<8x8xi1>, vector<8x8xf32>
    %cst_23 = arith.constant dense<0xFF800000> : vector<8xf32>
    %72 = vector.multi_reduction <maximumf>, %71, %cst_23 [1] : vector<8x8xf32> to vector<8xf32>
    %73 = vector.shape_cast %72 : vector<8xf32> to vector<8x1xf32>
    %74 = vector.broadcast %73 : vector<8x1xf32> to vector<8x8xf32>
    %75 = arith.subf %71, %74 : vector<8x8xf32>
    %76 = math.exp %75 : vector<8x8xf32>
    %cst_24 = arith.constant dense<0.000000e+00> : vector<8xf32>
    %77 = vector.multi_reduction <add>, %76, %cst_24 [1] : vector<8x8xf32> to vector<8xf32>
    %78 = vector.shape_cast %77 : vector<8xf32> to vector<8x1xf32>
    %79 = arith.truncf %76 : vector<8x8xf32> to vector<8x8xbf16>
    %cst_25 = arith.constant dense<0.000000e+00> : vector<8x8xf32>
    %80 = tpu.matmul %79, %68, %cst_25 {dimension_numbers = #tpu.dot_dimension_numbers<[1], [0], [0], [1], [0, 0, 1, 1], [], []>} : vector<8x8xbf16>, vector<8x8xbf16>, vector<8x8xf32> -> vector<8x8xf32>
    %81 = tpu.reciprocal %78 {approx = true} : vector<8x1xf32> -> vector<8x1xf32>
    %82 = vector.broadcast %81 : vector<8x1xf32> to vector<8x8xf32>
    %83 = arith.mulf %80, %82 : vector<8x8xf32>
    %84 = arith.truncf %83 : vector<8x8xf32> to vector<8x8xbf16>
    %c0_26 = arith.constant 0 : index
    %c16 = arith.constant 16 : index
    %85 = vector.load %arg11[%c0_26, %c16] : memref<8x32xbf16, #tpu.memory_space<vmem>>, vector<8x8xbf16>
    tpu.vector_store %arg11[%c0_26, %c16], %84 {strides = array<i32>} : memref<8x32xbf16, #tpu.memory_space<vmem>>, vector<8x8xbf16>,
    %86 = vector.extract_strided_slice %11 {offsets = [0, 24], sizes = [8, 8], strides = [1, 1]} : vector<8x32xf32> to vector<8x8xf32>
    %87 = arith.truncf %86 : vector<8x8xf32> to vector<8x8xbf16>
    %88 = vector.extract_strided_slice %12 {offsets = [0, 24], sizes = [8, 8], strides = [1, 1]} : vector<8x32xf32> to vector<8x8xf32>
    %89 = arith.truncf %88 : vector<8x8xf32> to vector<8x8xbf16>
    %90 = vector.extract_strided_slice %13 {offsets = [0, 24], sizes = [8, 8], strides = [1, 1]} : vector<8x32xf32> to vector<8x8xf32>
    %91 = arith.truncf %90 : vector<8x8xf32> to vector<8x8xbf16>
    %cst_27 = arith.constant dense<0.000000e+00> : vector<8x8xf32>
    %92 = tpu.matmul %87, %89, %cst_27 {dimension_numbers = #tpu.dot_dimension_numbers<[1], [1], [0], [0], [0, 0, 1, 0], [], []>} : vector<8x8xbf16>, vector<8x8xbf16>, vector<8x8xf32> -> vector<8x8xf32>
    %cst_28 = arith.constant -3.40282347E+38 : f32
    %93 = vector.broadcast %cst_28 : f32 to vector<8x8xf32>
    %94 = arith.select %16, %92, %93 : vector<8x8xi1>, vector<8x8xf32>
    %cst_29 = arith.constant dense<0xFF800000> : vector<8xf32>
    %95 = vector.multi_reduction <maximumf>, %94, %cst_29 [1] : vector<8x8xf32> to vector<8xf32>
    %96 = vector.shape_cast %95 : vector<8xf32> to vector<8x1xf32>
    %97 = vector.broadcast %96 : vector<8x1xf32> to vector<8x8xf32>
    %98 = arith.subf %94, %97 : vector<8x8xf32>
    %99 = math.exp %98 : vector<8x8xf32>
    %cst_30 = arith.constant dense<0.000000e+00> : vector<8xf32>
    %100 = vector.multi_reduction <add>, %99, %cst_30 [1] : vector<8x8xf32> to vector<8xf32>
    %101 = vector.shape_cast %100 : vector<8xf32> to vector<8x1xf32>
    %102 = arith.truncf %99 : vector<8x8xf32> to vector<8x8xbf16>
    %cst_31 = arith.constant dense<0.000000e+00> : vector<8x8xf32>
    %103 = tpu.matmul %102, %91, %cst_31 {dimension_numbers = #tpu.dot_dimension_numbers<[1], [0], [0], [1], [0, 0, 1, 1], [], []>} : vector<8x8xbf16>, vector<8x8xbf16>, vector<8x8xf32> -> vector<8x8xf32>
    %104 = tpu.reciprocal %101 {approx = true} : vector<8x1xf32> -> vector<8x1xf32>
    %105 = vector.broadcast %104 : vector<8x1xf32> to vector<8x8xf32>
    %106 = arith.mulf %103, %105 : vector<8x8xf32>
    %107 = arith.truncf %106 : vector<8x8xf32> to vector<8x8xbf16>
    %c0_32 = arith.constant 0 : index
    %c24 = arith.constant 24 : index
    %108 = vector.load %arg11[%c0_32, %c24] : memref<8x32xbf16, #tpu.memory_space<vmem>>, vector<8x8xbf16>
    tpu.vector_store %arg11[%c0_32, %c24], %107 {strides = array<i32>} : memref<8x32xbf16, #tpu.memory_space<vmem>>, vector<8x8xbf16>,
    %c0_33 = arith.constant 0 : index
    %c0_34 = arith.constant 0 : index
    %c0_35 = arith.constant 0 : index
    %109 = vector.load %arg9[%c0_33, %c0_34, %c0_35] : memref<1x8x32xf32, #tpu.memory_space<vmem>>, vector<1x8x32xf32>
    %110 = vector.shape_cast %109 : vector<1x8x32xf32> to vector<8x32xf32>
    %c0_36 = arith.constant 0 : index
    %c0_37 = arith.constant 0 : index
    %111 = vector.load %arg11[%c0_36, %c0_37] : memref<8x32xbf16, #tpu.memory_space<vmem>>, vector<8x32xbf16>
    %c0_38 = arith.constant 0 : index
    %c0_39 = arith.constant 0 : index
    %c0_40 = arith.constant 0 : index
    %112 = vector.load %arg5[%c0_38, %c0_39, %c0_40] : memref<1x32x32xbf16, #tpu.memory_space<vmem>>, vector<1x32x32xbf16>
    %113 = vector.shape_cast %112 : vector<1x32x32xbf16> to vector<32x32xbf16>
    %cst_41 = arith.constant dense<0.000000e+00> : vector<8x32xf32>
    %114 = tpu.matmul %111, %113, %cst_41 {dimension_numbers = #tpu.dot_dimension_numbers<[1], [0], [0], [1], [0, 0, 1, 1], [], []>} : vector<8x32xbf16>, vector<32x32xbf16>, vector<8x32xf32> -> vector<8x32xf32>
    %115 = arith.addf %110, %114 : vector<8x32xf32>
    %c0_42 = arith.constant 0 : index
    %c0_43 = arith.constant 0 : index
    %c0_44 = arith.constant 0 : index
    %116 = vector.load %arg9[%c0_42, %c0_43, %c0_44] : memref<1x8x32xf32, #tpu.memory_space<vmem>>, vector<1x8x32xf32>
    %117 = vector.shape_cast %116 : vector<1x8x32xf32> to vector<8x32xf32>
    %118 = vector.shape_cast %115 : vector<8x32xf32> to vector<1x8x32xf32>
    tpu.vector_store %arg9[%c0_42, %c0_43, %c0_44], %118 {strides = array<i32>} : memref<1x8x32xf32, #tpu.memory_space<vmem>>, vector<1x8x32xf32>,
    return
  }
  func.func @transform_0(%arg0: i32, %arg1: i32) -> (i32, i32, i32) {
    %c0_i32 = arith.constant 0 : i32
    %c0_i32_0 = arith.constant 0 : i32
    %c0_i32_1 = arith.constant 0 : i32
    return %arg0, %c0_i32, %c0_i32_0 : i32, i32, i32
  }
  func.func @transform_1(%arg0: i32, %arg1: i32) -> (i32, i32, i32) {
    %c0_i32 = arith.constant 0 : i32
    %c0_i32_0 = arith.constant 0 : i32
    %c0_i32_1 = arith.constant 0 : i32
    return %arg1, %c0_i32, %c0_i32_0 : i32, i32, i32
  }
  func.func @transform_2(%arg0: i32, %arg1: i32) -> (i32, i32, i32) {
    %c0_i32 = arith.constant 0 : i32
    %c0_i32_0 = arith.constant 0 : i32
    %c0_i32_1 = arith.constant 0 : i32
    return %arg1, %c0_i32, %c0_i32_0 : i32, i32, i32
  }
  func.func @transform_3(%arg0: i32, %arg1: i32) -> (i32, i32, i32) {
    %c0_i32 = arith.constant 0 : i32
    %c0_i32_0 = arith.constant 0 : i32
    %c0_i32_1 = arith.constant 0 : i32
    return %arg1, %c0_i32, %c0_i32_0 : i32, i32, i32
  }
  func.func @transform_4(%arg0: i32, %arg1: i32) -> (i32, i32) {
    %c0_i32 = arith.constant 0 : i32
    %c0_i32_0 = arith.constant 0 : i32
    %c0_i32_1 = arith.constant 0 : i32
    return %c0_i32, %c0_i32_0 : i32, i32
  }
  func.func @transform_5(%arg0: i32, %arg1: i32) -> (i32, i32) {
    %c0_i32 = arith.constant 0 : i32
    %c0_i32_0 = arith.constant 0 : i32
    %c0_i32_1 = arith.constant 0 : i32
    return %c0_i32, %c0_i32_0 : i32, i32
  }
  func.func @transform_6(%arg0: i32, %arg1: i32) -> (i32, i32) {
    %c0_i32 = arith.constant 0 : i32
    %c0_i32_0 = arith.constant 0 : i32
    %c0_i32_1 = arith.constant 0 : i32
    return %c0_i32, %c0_i32_0 : i32, i32
  }
  func.func @transform_7(%arg0: i32, %arg1: i32) -> (i32, i32, i32) {
    %c0_i32 = arith.constant 0 : i32
    %c0_i32_0 = arith.constant 0 : i32
    %c0_i32_1 = arith.constant 0 : i32
    return %arg0, %c0_i32, %c0_i32_0 : i32, i32, i32
  }
}

</mosaic_0001>

<bundles_post_ra>
// kernel: tpu_custom_call.1
= control target key start
LH: loop header
LB: loop body
LE: loop exit
PB: predicated region body
PF: predicated region fallthrough
CT: control target
= control target key end

     0   :  { %s2306_s0 = inlined_call_operand.hbm [shape: f32[2,8,32], index: 0, kind: input, shape index: {}]   ;;  %s2307_s1 = inlined_call_operand.hbm [shape: bf16[1,32,96], index: 1, kind: input, shape index: {}]   ;;  %s2308_s2 = inlined_call_operand.hbm [shape: f32[1,1,96], index: 2, kind: input, shape index: {}]   ;;  %s2309_s3 = inlined_call_operand.hbm [shape: bf16[1,32,32], index: 3, kind: input, shape index: {}]   ;;  %s2310_s4 = inlined_call_operand.hbm [shape: f32[1,32], index: 4, kind: input, shape index: {}]   ;;  %s2311_s5 = inlined_call_operand.hbm [shape: f32[1,32], index: 5, kind: input, shape index: {}]   ;;  %s2312_s6 = inlined_call_operand.hbm [shape: f32[1,32], index: 6, kind: input, shape index: {}]   ;;  %s2313_s7 = inlined_call_operand.hbm [shape: f32[2,8,32], index: 7, kind: output, shape index: {}]  }
   0x1   :  { %2320 = sst [smem:[#allocation22_spill]] %s2307_s1 }
   0x2   :  { %2321 = sst [smem:[#allocation23_spill]] %s2313_s7 }
   0x3   :  { %12 = vsyncpa [#allocation5], 0 }
   0x4   :  { %14 = vsyncpa [#allocation5 + $0x1], 0 }
   0x5   :  { %15 = vsyncpa [#allocation8], 0 }
   0x6   :  { %16 = vsyncpa [#allocation11], 0 }
   0x7   :  { %17 = vsyncpa [#allocation14], 0 }
   0x8   :  { %18 = vsyncpa [#allocation6], 0 }
   0x9   :  { %20 = vsyncpa [#allocation6 + $0x1], 0  ;;  %s1882_s24 = smov 0   ;;  %s1884_s25 = smov 0  }
   0xa   :  { %s1886_s26 = smov 0   ;;  %s1888_s27 = smov 0  }
   0xb   :  { %s1890_s28 = smov 0   ;;  %s1892_s29 = smov 0  }
   0xc LB: > { %s2314_s30 = sadd.s32 4294967295, %s1814_s29   ;;  %p1226_p0 = scmp.ge.s32.totalorder %s1814_s29, 1  ;;  %s1814_s29 = sphi %s1892_s29, %s26_s29   ;;  %s1810_s28 = sphi %s1890_s28, %s2344_s28   ;;  %s1806_s27 = sphi %s1888_s27, %s2343_s27   ;;  %s1802_s26 = sphi %s1886_s26, %s2342_s26   ;;  %s1798_s25 = sphi %s1884_s25, %s2341_s25   ;;  %s1794_s24 = sphi %s1882_s24, %s2340_s24  }
   0xd   : > { %p1916_p1 = scmp.eq.s32.totalorder %s2314_s30, 0  ;;  %p236_p2 = scmp.lt.s32.totalorder %s1814_s29, 3 }
   0xe   : > { %s1816_s10 = smov [#allocation7]   ;;  %s1817_s13 = smov [#allocation10]  }
   0xf   : > { %s2322_s8 = scalar_select %p1916_p1, 1, 0 }
  0x10   : > { %p1921_p3 = pnand %p1226_p0, %p236_p2  ;;  %s251_s11 = sshll.u32 %s1816_s10, 4  ;;  %s1925_s11 = int_to_ptr.vmem [resolvable:$true] %s251_s11 }
  0x11   : > { %s280_s14 = sshll.u32 %s1817_s13, 4  ;;  %s1818_s15 = smov [#allocation13]   ;;  %s1936_s14 = int_to_ptr.vmem [resolvable:$true] %s280_s14 }
  0x12   : > { %s2323_s9 = scalar_select %p1921_p3, 1, 0 }
  0x13   : > { %p1387_p4 = pneg %p1921_p3  ;;  %s1938_s16 = sshll.u32 %s1818_s15, 4  ;;  %s306_s16 = int_to_ptr.vmem [resolvable:$true] %s1938_s16 }
  0x14   : > { %s2325_s1 = sld [smem:[#allocation22_spill]] }
  0x15   : > { %p1932_p6 = pnand %p1387_p4, %p1916_p1 }
  0x17   : > { %p1948_p8 = pneg %p1932_p6 }
  0x1a   : > { %s1522_s19 = scalar_lea.hbm %s2325_s1, 256 }
  0x1b   : > { %p1523_p7 = scmp.ne.s32.totalorder %s2325_s1, %s1522_s19  ;;  %p1529_p11 = scmp.lt.u32.totalorder %s1522_s19, %s2325_s1 }
  0x1d   : > { %p1525_p9 = pnand %p1948_p8, %p1523_p7 }
  0x1f   : > { %p1526_p10 = pneg %p1525_p9 }
  0x21   : > { %p1531_p12 = pnand %p1529_p11, %p1526_p10 }
  0x23   : > { %1534 = shalt.err (!%p1531_p12)
}
  0x24   : > { %s1535_s13 = scalar_lea.vmem %s1925_s11, 256  ;;  %p1543_p4 = scmp.lt.s32.totalorder %s1925_s11, %s1925_s11 }
  0x25   : > { %p1536_p13 = scmp.ne.s32.totalorder %s1925_s11, %s1535_s13  ;;  %p1544_p5 = scmp.lt.s32.totalorder %s1535_s13, %s1535_s13 }
  0x27   : > { %p1538_p0 = pnand %p1536_p13, %p1948_p8  ;;  %p1545_p7 = por %p1544_p5, %p1543_p4 }
  0x29   : > { %p1539_p2 = pneg %p1538_p0 }
  0x2b   : > { %p1546_p9 = pnand %p1545_p7, %p1539_p2 }
  0x2d   : > { %1549 = shalt.err (!%p1546_p9)
}
  0x2e   : > { %s1819_s15 = smov 64   ;;  %s1820_s17 = smov 4  }
  0x2f   : > { %1390 = dma.hbm_to_vmem [thread:$0]  (!%p1932_p6), %s2325_s1, 256, %s1925_s11, [#allocation8], %s1819_s15, %s1819_s15, %s1820_s17  }
  0x30   : > { %s1550_s23 = scalar_lea.hbm %s2309_s3, 256 }
  0x31   : > { %p1551_p5 = scmp.ne.s32.totalorder %s2309_s3, %s1550_s23  ;;  %p1557_p12 = scmp.lt.u32.totalorder %s1550_s23, %s2309_s3 }
  0x33   : > { %p1553_p10 = pnand %p1551_p5, %p1948_p8 }
  0x35   : > { %p1554_p11 = pneg %p1553_p10 }
  0x37   : > { %p1559_p13 = pnand %p1557_p12, %p1554_p11 }
  0x39   : > { %1562 = shalt.err (!%p1559_p13)
}
  0x3a   : > { %s1563_s11 = scalar_lea.vmem %s1936_s14, 256  ;;  %p1571_p7 = scmp.lt.s32.totalorder %s1936_s14, %s1936_s14 }
  0x3b   : > { %p1564_p0 = scmp.ne.s32.totalorder %s1936_s14, %s1563_s11  ;;  %p1572_p9 = scmp.lt.s32.totalorder %s1563_s11, %s1563_s11 }
  0x3d   : > { %p1566_p2 = pnand %p1564_p0, %p1948_p8  ;;  %p1573_p5 = por %p1572_p9, %p1571_p7 }
  0x3f   : > { %p1567_p4 = pneg %p1566_p2 }
  0x41   : > { %p1574_p10 = pnand %p1573_p5, %p1567_p4 }
  0x43   : > { %1577 = shalt.err (!%p1574_p10)
}
  0x44   : > { %1396 = dma.hbm_to_vmem [thread:$0]  (!%p1932_p6), %s2309_s3, 256, %s1936_s14, [#allocation11], %s1819_s15, %s1819_s15, %s1820_s17  }
  0x45   : > { %s1578_s20 = scalar_lea.hbm %s2311_s5, 16 }
  0x46   : > { %p1579_p11 = scmp.ne.s32.totalorder %s2311_s5, %s1578_s20  ;;  %p1585_p0 = scmp.lt.u32.totalorder %s1578_s20, %s2311_s5 }
  0x48   : > { %p1581_p12 = pnand %p1579_p11, %p1948_p8 }
  0x4a   : > { %p1582_p13 = pneg %p1581_p12 }
  0x4c   : > { %p1587_p2 = pnand %p1585_p0, %p1582_p13 }
  0x4e   : > { %1590 = shalt.err (!%p1587_p2)
}
  0x4f   : > { %s1591_s11 = scalar_lea.vmem %s306_s16, 16  ;;  %s1598_s14 = scalar_lea.vmem %s306_s16, 32 }
  0x50   : > { %p1592_p4 = scmp.ne.s32.totalorder %s306_s16, %s1591_s11  ;;  %p1599_p5 = scmp.lt.s32.totalorder %s306_s16, %s306_s16 }
  0x51   : > { %p1600_p10 = scmp.lt.s32.totalorder %s1598_s14, %s1591_s11 }
  0x52   : > { %p1594_p7 = pnand %p1592_p4, %p1948_p8 }
  0x53   : > { %p1601_p3 = por %p1600_p10, %p1599_p5 }
  0x54   : > { %p1595_p9 = pneg %p1594_p7 }
  0x56   : > { %p1602_p1 = pnand %p1601_p3, %p1595_p9 }
  0x58   : > { %1605 = shalt.err (!%p1602_p1)
}
  0x59   : > { %1402 = dma.hbm_to_vmem [thread:$0]  (!%p1932_p6), %s2311_s5, 16, %s306_s16, [#allocation14]  }
  0x5a   : > { %s1821_s7 = smov [#allocation9]   ;;  %s1822_s18 = smov [#allocation12]  }
  0x5b   : > { %s267_s30 = sshll.u32 %s1821_s7, 4  ;;  %s294_s19 = sshll.u32 %s1822_s18, 4  ;;  %s268_s30 = int_to_ptr.vmem [resolvable:$true] %s267_s30  ;;  %s295_s19 = int_to_ptr.vmem [resolvable:$true] %s294_s19 }
  0x5c   : > { %s1606_s23 = scalar_lea.hbm %s2308_s2, 16 }
  0x5d   : > { %p1607_p1 = scmp.ne.s32.totalorder %s2308_s2, %s1606_s23  ;;  %p1613_p12 = scmp.lt.u32.totalorder %s1606_s23, %s2308_s2 }
  0x5f   : > { %p1609_p3 = pnand %p1607_p1, %p1948_p8 }
  0x61   : > { %p1610_p11 = pneg %p1609_p3 }
  0x63   : > { %p1615_p13 = pnand %p1613_p12, %p1610_p11 }
  0x65   : > { %1618 = shalt.err (!%p1615_p13)
}
  0x66   : > { %s1619_s16 = scalar_lea.vmem %s268_s30, 16  ;;  %s1626_s15 = scalar_lea.vmem %s268_s30, 32 }
  0x67   : > { %p1620_p0 = scmp.ne.s32.totalorder %s268_s30, %s1619_s16  ;;  %p1627_p7 = scmp.lt.s32.totalorder %s268_s30, %s268_s30 }
  0x68   : > { %p1628_p9 = scmp.lt.s32.totalorder %s1626_s15, %s1619_s16 }
  0x69   : > { %p1622_p2 = pnand %p1620_p0, %p1948_p8 }
  0x6a   : > { %p1629_p5 = por %p1628_p9, %p1627_p7 }
  0x6b   : > { %p1623_p4 = pneg %p1622_p2 }
  0x6d   : > { %p1630_p10 = pnand %p1629_p5, %p1623_p4 }
  0x6f   : > { %1633 = shalt.err (!%p1630_p10)
}
  0x70   : > { %1393 = dma.hbm_to_vmem [thread:$0]  (!%p1932_p6), %s2308_s2, 16, %s268_s30, [#allocation8]  }
  0x71   : > { %s1634_s21 = scalar_lea.hbm %s2310_s4, 16 }
  0x72   : > { %p1635_p1 = scmp.ne.s32.totalorder %s2310_s4, %s1634_s21  ;;  %p1641_p12 = scmp.lt.u32.totalorder %s1634_s21, %s2310_s4 }
  0x74   : > { %p1637_p3 = pnand %p1635_p1, %p1948_p8 }
  0x76   : > { %p1638_p11 = pneg %p1637_p3 }
  0x78   : > { %p1643_p13 = pnand %p1641_p12, %p1638_p11 }
  0x7a   : > { %1646 = shalt.err (!%p1643_p13)
}
  0x7b   : > { %s1647_s14 = scalar_lea.vmem %s295_s19, 16  ;;  %s1654_s30 = scalar_lea.vmem %s295_s19, 32 }
  0x7c   : > { %p1648_p0 = scmp.ne.s32.totalorder %s295_s19, %s1647_s14  ;;  %p1655_p7 = scmp.lt.s32.totalorder %s295_s19, %s295_s19 }
  0x7d   : > { %p1656_p9 = scmp.lt.s32.totalorder %s1654_s30, %s1647_s14 }
  0x7e   : > { %p1650_p2 = pnand %p1648_p0, %p1948_p8 }
  0x7f   : > { %p1657_p5 = por %p1656_p9, %p1655_p7 }
  0x80   : > { %p1651_p4 = pneg %p1650_p2 }
  0x82   : > { %p1658_p10 = pnand %p1657_p5, %p1651_p4 }
  0x84   : > { %1661 = shalt.err (!%p1658_p10)
}
  0x85   : > { %1399 = dma.hbm_to_vmem [thread:$0]  (!%p1932_p6), %s2310_s4, 16, %s295_s19, [#allocation11]  }
  0x86   : > { %s1823_s17 = smov [#allocation15]   ;;  %s1662_s21 = scalar_lea.hbm %s2312_s6, 16 }
  0x87   : > { %s316_s7 = sshll.u32 %s1823_s17, 4  ;;  %p1663_p1 = scmp.ne.s32.totalorder %s2312_s6, %s1662_s21  ;;  %s317_s7 = int_to_ptr.vmem [resolvable:$true] %s316_s7 }
  0x88   : > { %p1669_p12 = scmp.lt.u32.totalorder %s1662_s21, %s2312_s6 }
  0x89   : > { %p1665_p3 = pnand %p1663_p1, %p1948_p8 }
  0x8b   : > { %p1666_p11 = pneg %p1665_p3 }
  0x8d   : > { %p1671_p13 = pnand %p1669_p12, %p1666_p11 }
  0x8f   : > { %1674 = shalt.err (!%p1671_p13)
}
  0x90   : > { %s1675_s19 = scalar_lea.vmem %s317_s7, 16  ;;  %s1682_s14 = scalar_lea.vmem %s317_s7, 32 }
  0x91   : > { %p1676_p0 = scmp.ne.s32.totalorder %s317_s7, %s1675_s19  ;;  %p1683_p7 = scmp.lt.s32.totalorder %s317_s7, %s317_s7 }
  0x92   : > { %p1684_p9 = scmp.lt.s32.totalorder %s1682_s14, %s1675_s19 }
  0x93   : > { %p1678_p2 = pnand %p1676_p0, %p1948_p8 }
  0x94   : > { %p1685_p5 = por %p1684_p9, %p1683_p7 }
  0x95   : > { %p1679_p4 = pneg %p1678_p2 }
  0x97   : > { %p1686_p10 = pnand %p1685_p5, %p1679_p4 }
  0x99   : > { %1689 = shalt.err (!%p1686_p10)
}
  0x9a   : > { %1405 = dma.hbm_to_vmem [thread:$0]  (!%p1932_p6), %s2312_s6, 16, %s317_s7, [#allocation14]  }
  0x9b   : > { %s1225_s22 = sadd.s32 4294967294, %s1814_s29   ;;  %s38_s15 = sadd.s32 1, %s1810_s28 }
  0x9c   : > { %p40_p8 = scmp.ge.s32.totalorder %s38_s15, 2  ;;  %s45_s12 = sadd.s32 1, %s1802_s26 }
  0x9d   : > { %p52_p1 = scmp.ne.s32.totalorder %s1802_s26, %s1798_s25  ;;  %p53_p3 = scmp.eq.s32.totalorder %s1814_s29, 0 }
  0x9e   : > { %s2346_s15 = smov (%p40_p8, %s38_s15), 0  ;;  %p58_p12 = scmp.ne.s32.totalorder %s1798_s25, %s1794_s24 }
  0x9f   : > { %p2073_p11 = por %p53_p3, %p52_p1  ;;  %s42_s7 = ssub.s32 %s1810_s28, %s2346_s15 }
  0xa0   : > { %s2328_s18 = sadd.s32 4294967295, %s1814_s29   ;;  %p43_p13 = scmp.eq.s32.totalorder %s42_s7, 0 }
  0xa1   : > { %p223_p6 = scmp.eq.s32.totalorder %s2328_s18, 1  ;;  %p2329_p0 = scmp.ne.s32.totalorder %s2322_s8, 0 }
  0xa2   : > { %p229_p7 = scmp.eq.s32.totalorder %s1225_s22, 1  ;;  %p1420_p5 = scmp.lt.s32.totalorder %s1814_s29, 2 }
  0xa3   : > { %p2085_p2 = por %p2329_p0, %p58_p12  ;;  %p2089_p4 = por %p223_p6, %p52_p1 }
  0xa4   : > { %s2094_s23 = scalar_select %p43_p13, %s1802_s26, %s45_s12  }
  0xa5   : > { %s2331_s21 = scalar_select %p2089_p4, 1, 0 }
  0xa6   : > { %p2096_p9 = por %p229_p7, %p58_p12  ;;  %s327_s13 = sand.u32 1, %s1802_s26  }
  0xa7   : > { %s1235_s11 = sshll.u32 %s1810_s28, 7  ;;  %s1234_s19 = sshll.u32 %s327_s13, 3 }
  0xa8   : > { %s2332_s10 = scalar_select %p2096_p9, 1, 0 }
  0xa9   : > { %s2106_s16 = scalar_lea.hbm %s2306_s0, %s1235_s11  ;;  %s331_s22 = scalar_lea.vmem [#allocation4], %s1234_s19 }
  0xaa   : > { %s338_s12 = sshll.u32 %s331_s22, 4  ;;  %p2110_p10 = pnand %p1420_p5, %p2073_p11  ;;  %s2114_s12 = int_to_ptr.vmem [resolvable:$true] %s338_s12 }
  0xab   : > { %s328_s18 = scalar_lea.sflag [#allocation5], %s327_s13  ;;  %s1690_s1 = scalar_lea.hbm %s2106_s16, 128 }
  0xac   : > { %p1691_p8 = scmp.ne.s32.totalorder %s2106_s16, %s1690_s1  ;;  %p1692_p1 = pneg %p2110_p10 }
  0xad   : > { %s1695_s17 = scalar_lea.hbm %s2306_s0, 256  ;;  %p1696_p11 = scmp.lt.u32.totalorder %s2106_s16, %s2306_s0 }
  0xae   : > { %p1693_p3 = pnand %p1692_p1, %p1691_p8  ;;  %p1697_p6 = scmp.lt.u32.totalorder %s1695_s17, %s1690_s1 }
  0xaf   : > { %p1699_p0 = scmp.lt.u32.totalorder %s1690_s1, %s2106_s16 }
  0xb0   : > { %p1694_p12 = pneg %p1693_p3  ;;  %p1698_p13 = por %p1697_p6, %p1696_p11 }
  0xb2   : > { %p1700_p7 = por %p1699_p0, %p1698_p13 }
  0xb4   : > { %p1701_p5 = pnand %p1700_p7, %p1694_p12 }
  0xb6   : > { %1704 = shalt.err (!%p1701_p5)
}
  0xb7   : > { %s1705_s13 = scalar_lea.vmem %s2114_s12, 128  ;;  %s1824_s22 = smov [#allocation4]  }
  0xb8   : > { %p1706_p8 = scmp.ne.s32.totalorder %s2114_s12, %s1705_s13  ;;  %s1710_s11 = sshll.u32 %s1824_s22, 4  ;;  %s1711_s11 = int_to_ptr.vmem [resolvable:$false] %s1710_s11 }
  0xb9   : > { %s1712_s19 = scalar_lea.vmem %s1711_s11, 256  ;;  %p1713_p4 = scmp.lt.s32.totalorder %s2114_s12, %s1711_s11 }
  0xba   : > { %p1708_p3 = pnand %p1706_p8, %p1692_p1  ;;  %p1714_p11 = scmp.lt.s32.totalorder %s1712_s19, %s1705_s13 }
  0xbc   : > { %p1709_p9 = pneg %p1708_p3  ;;  %p1715_p6 = por %p1714_p11, %p1713_p4 }
  0xbe   : > { %p1716_p13 = pnand %p1715_p6, %p1709_p9 }
  0xc0   : > { %1719 = shalt.err (!%p1716_p13)
}
  0xc1   : > { %1409 = dma.hbm_to_vmem [thread:$0]  (!%p2110_p10), %s2106_s16, 128, %s2114_s12, %s328_s18  }
  0xc2   : > { %p2334_p12 = scmp.ne.s32.totalorder %s2323_s9, 0 }
  0xc3   : > { %s2144_s1 = sand.u32 (!%p2334_p12), 1, %s1798_s25  }
  0xc4   : > { %347 = sbr.rel (%p2334_p12) target bundleno = 1875 (0x753), region = 48  ;;  %s1237_s17 = sshll.u32 (!%p2334_p12), %s2144_s1, 3 }
  0xc5   : > { %s350_s14 = scalar_lea.sflag (!%p2334_p12), [#allocation5], %s2144_s1  ;;  %s353_s30 = scalar_lea.vmem (!%p2334_p12), [#allocation4], %s1237_s17 }
  0xcb   : > { %1773 = dma.done.wait (%p2085_p2), %s350_s14, 128  }
  0xcc   : > { %1775 = vsyncadd (%p2085_p2), %s350_s14, 4294967168  ;;  %p2335_p4 = scmp.ne.s32.totalorder %s2322_s8, 0 }
  0xce   : > { %1777 = dma.done.wait (%p2335_p4), [#allocation8], 272  }
  0xcf   : > { %1779 = vsyncadd (%p2335_p4), [#allocation8], 4294967024 }
  0xd0   : > { %1781 = dma.done.wait (%p2335_p4), [#allocation11], 272  }
  0xd1   : > { %1783 = vsyncadd (%p2335_p4), [#allocation11], 4294967024 }
  0xd2   : > { %1785 = dma.done.wait (%p2335_p4), [#allocation14], 32  }
  0xd3   : > { %1787 = vsyncadd (%p2335_p4), [#allocation14], 4294967264  ;;  %vm414_vm0 = vcmask 261120   ;;  %v2166_v0 = vld [vmem:[%s353_s30] sm:$0xff]  ;;  %v1500_v7 = vld [vmem:[#allocation7] sm:$0xff]   ;;  %v1825_v8 = vmov 0.0   ;;  %v525_v39 = vlaneseq }
  0xd4   : > { %v415_v1 = vsel %vm414_vm0, %v2166_v0, 0.0  ;;  %1295 = vmatprep.subr.bf16.mxu0 %v1825_v8  ;;  %1303 = vmatprep.subr.bf16.mxu1 %v1825_v8  ;;  %v1501_v9 = vld [vmem:[#allocation7 + $0x8] sm:$0xff]   ;;  %vm1826_vm1 = vmmov 0   ;;  %v1245_v14 = vld [vmem:[#allocation13] ss:$0 sm:$0xff]  ;;  %vm446_vm2 = vcmask 257024  }
  0xd5   : > { %416 = vadd.xlane.f32.xlu0 %v415_v1  ;;  %1296 = vmatpush3.bf16.msra.mxu0 %v1500_v7  ;;  %v1246_v16 = vld [vmem:[#allocation15] ss:$0 sm:$0xff]  ;;  %v1248_v21 = vld [vmem:[#allocation9] ss:$0 sm:$0xff]  ;;  %s1827_s8 = smov 120   ;;  %s1828_s9 = smov 96  }
  0xd6   : > { %1299 = vmatprep.mubr.msk.bf16.mxu0 %vm1826_vm1, %v1825_v8  ;;  %1297 = vmatprep.subr.bf16.mxu0 %v1825_v8  ;;  %s1829_s20 = smov 88   ;;  %s1830_s16 = smov 80   ;;  %vm534_vm3 = vcmask 64512   ;;  %v526_v40 = vshrl.u32 %v525_v39, 7  ;;  %v528_v41 = vand.u32 127, %v525_v39  ;;  %vm597_vm5 = vcmask 1043456  }
  0xd7   : > { %1305 = vmatprep.mubr.msk.bf16.mxu1 %vm1826_vm1, %v1825_v8  ;;  %s1831_s12 = smov 112   ;;  %s1832_s7 = smov 72   ;;  %vm644_vm6 = vcmask 60416   ;;  %vm764_vm7 = vcmask 126016   ;;  %vm884_vm8 = vcmask 191616   ;;  %vm1004_vm9 = vcmask 257216  }
  0xd8   : > { %s1833_s18 = smov 104   ;;  %vm529_vm4 = vcmp.le.s32.totalorder %v528_v41, %v526_v40  ;;  %s1834_s13 = smov 64  }
  0xd9   : > { %1298 = vmatpush3.bf16.msra.mxu0 %v1501_v9  ;;  %s1835_s22 = smov 56   ;;  %s1836_s11 = smov 48  }
  0xda   : > { %1309 = vmatprep.subr.bf16.mxu0 %v1825_v8  ;;  %s1837_s19 = smov 40   ;;  %s1838_s14 = smov 8  }
  0xdb   : > { %s1839_s30 = smov 16   ;;  %p2337_p9 = scmp.ne.s32.totalorder %s2331_s21, 0 }
 0x162   : > { %v417_v2 = vpop.xlane.xlu0 %416 }
 0x163   : > { %v419_v3 = vmul.f32 0.03125, %v417_v2 }
 0x165   : > { %v420_v4 = vsub.f32 %v2166_v0, %v419_v3 }
 0x167   : > { %v421_v5 = vmul.f32 %v420_v4, %v420_v4 }
 0x169   : > { %v422_v6 = vsel %vm414_vm0, %v421_v5, 0.0 }
 0x16a   : > { %423 = vadd.xlane.f32.xlu0 %v422_v6 }
 0x1f7   : > { %v424_v10 = vpop.xlane.xlu0 %423 }
 0x1f8   : > { %v425_v11 = vmul.f32 0.03125, %v424_v10 }
 0x1fa   : > { %v426_v12 = vadd.f32 1e-05, %v425_v11 }
 0x1fc   : > { %1504 = vrsqrt.f32 %v426_v12 }
 0x206   : > { %v1505_v13 = vpop.eup %1504 }
 0x207   : > { %v428_v15 = vmul.f32 %v1505_v13, %v420_v4 }
 0x209   : > { %v436_v17 = vmul.f32 %v1245_v14, %v428_v15 }
 0x20b   : > { %v444_v18 = vadd.f32 %v1246_v16, %v436_v17 }
 0x20d   : > { %v445_v19 = vpack.c.bf16 %v444_v18, %v444_v18 }
 0x20f   : > { %447 = vst.msk [vmem:[#allocation2] sm:$0xf] %vm446_vm2, %v445_v19 }
 0x216   : > { %v457_v20 = vld [vmem:[#allocation2] sm:$0xf] }
 0x217   : > { %1300 = vmatmul.mubr.msk.bf16.vlgmr.msra.gmra.mrb[0].mxu0 %vm414_vm0, %v457_v20 }
 0x218   : > { %1311 = vmatprep.mubr.msk.bf16.mxu0 %vm1826_vm1, %v1825_v8 }
 0x2ea   : > { %v519_v22 = vpop.f32.mrb[0].mxu0 }
 0x2eb   : > { %v520_v23 = vadd.f32 %v1248_v21, %v519_v22  ;;  %v1301_v24 = vpop.f32.mrb[1].mxu0 }
 0x2ec   : > { %v522_v25 = vpop.f32.mrb[2].mxu0 }
 0x2ed   : > { %v2183_v26 = vpack.c.bf16 %v520_v23, %v520_v23  ;;  %v1302_v27 = vpop.f32.mrb[3].mxu0 }
 0x2ef   : > { %646 = vrot.lane.b32.xlu0 %v2183_v26, %s1827_s8  ;;  %532 = vrot.lane.b32.xlu1 %v2183_v26, %s1828_s9  ;;  %s407_s8 = scalar_lea.vmem [#allocation16], %s1237_s17  ;;  %s1840_s9 = smov 24  }
 0x2f0   : > { %s1267_s17 = sshll.u32 %s1806_s27, 7 }
 0x2f3   : > { %648 = vrot.lane.b32.xlu1 %v2183_v26, %s1829_s20  ;;  %s1083_s20 = sshll.u32 %s407_s8, 4  ;;  %s2258_s20 = int_to_ptr.vmem [resolvable:$true] %s1083_s20 }
 0x2f4   : > { %s1720_s27 = scalar_lea.vmem %s2258_s20, 128 }
 0x2f5   : > { %p1721_p2 = scmp.ne.s32.totalorder %s2258_s20, %s1720_s27 }
 0x2f7   : > { %768 = vrot.lane.b32.xlu1 %v2183_v26, %s1830_s16  ;;  %p1722_p10 = pnand %p1721_p2, %p2337_p9 }
 0x2f9   : > { %p1723_p1 = pneg %p1722_p10 }
 0x2fb   : > { %766 = vrot.lane.b32.xlu1 %v2183_v26, %s1831_s12 }
 0x2ff   : > { %888 = vrot.lane.b32.xlu1 %v2183_v26, %s1832_s7  ;;  %s2336_s7 = sld [smem:[#allocation23_spill]] }
 0x303   : > { %886 = vrot.lane.b32.xlu1 %v2183_v26, %s1833_s18 }
 0x305   : > { %s2256_s18 = scalar_lea.hbm %s2336_s7, %s1267_s17 }
 0x361   : > { %v533_v28 = vpop.permute.xlu1 %532  ;;  %v647_v33 = vpop.permute.xlu0 %646 }
 0x362   : > { %v539_v29 = vsel %vm534_vm3, %v533_v28, 0 }
 0x363   : > { %1304 = vmatpush3.bf16.xpose.msra.mxu1 %v539_v29 }
 0x364   : > { %1315 = vmatprep.subr.bf16.mxu1 %v1825_v8 }
 0x365   : > { %v649_v30 = vpop.permute.xlu1 %648 }
 0x366   : > { %v654_v31 = vsel %vm534_vm3, %v649_v30, 0 }
 0x369   : > { %v769_v32 = vpop.permute.xlu1 %768 }
 0x36a   : > { %1306 = vmatmul.mubr.msk.bf16.vlgmr.msra.gmra.mrb[0].mxu1 %vm534_vm3, %v2183_v26  ;;  %v774_v35 = vsel %vm534_vm3, %v769_v32, 0 }
 0x36b   : > { %1316 = vmatpush3.bf16.xpose.msra.mxu1 %v654_v31  ;;  %1317 = vmatprep.mubr.msk.bf16.mxu1 %vm1826_vm1, %v1825_v8 }
 0x36c   : > { %1327 = vmatprep.subr.bf16.mxu1 %v1825_v8 }
 0x36d   : > { %v767_v34 = vpop.permute.xlu1 %766 }
 0x371   : > { %v889_v36 = vpop.permute.xlu1 %888 }
 0x372   : > { %1318 = vmatmul.mubr.msk.bf16.vlgmr.msra.gmra.mrb[4].mxu1 %vm534_vm3, %v647_v33  ;;  %v894_v37 = vsel %vm534_vm3, %v889_v36, 0 }
 0x373   : > { %1328 = vmatpush3.bf16.xpose.msra.mxu1 %v774_v35  ;;  %1329 = vmatprep.mubr.msk.bf16.mxu1 %vm1826_vm1, %v1825_v8 }
 0x374   : > { %1339 = vmatprep.subr.bf16.mxu1 %v1825_v8 }
 0x375   : > { %v887_v38 = vpop.permute.xlu1 %886 }
 0x37a   : > { %1330 = vmatmul.mubr.msk.bf16.vlgmr.msra.gmra.mrb[8].mxu1 %vm534_vm3, %v767_v34 }
 0x37b   : > { %1340 = vmatpush3.bf16.xpose.msra.mxu1 %v894_v37  ;;  %1341 = vmatprep.mubr.msk.bf16.mxu1 %vm1826_vm1, %v1825_v8 }
 0x37c   : > { %1351 = vmatprep.subr.bf16.mxu1 %v1825_v8 }
 0x382   : > { %1342 = vmatmul.mubr.msk.bf16.vlgmr.msra.gmra.mrb[12].mxu1 %vm534_vm3, %v887_v38 }
 0x383   : > { %1355 = vmatprep.mubr.msk.bf16.mxu1 %vm1826_vm1, %v1825_v8 }
 0x43d   : > { %v575_v42 = vpop.f32.mrb[0].mxu1 }
 0x43e   : > { %v581_v43 = vsel %vm529_vm4, %v575_v42, -3.4028235e+38  ;;  %v1307_v44 = vpop.f32.mrb[1].mxu1 }
 0x43f   : > { %v578_v45 = vpop.f32.mrb[2].mxu1  ;;  %v582_v46 = vsel %vm534_vm3, %v581_v43, -inf }
 0x440   : > { %583 = vmax.xlane.f32.xlu1 %v582_v46  ;;  %v1308_v47 = vpop.f32.mrb[3].mxu1 }
 0x445   : > { %v690_v48 = vpop.f32.mrb[4].mxu1 }
 0x446   : > { %v696_v49 = vsel %vm529_vm4, %v690_v48, -3.4028235e+38  ;;  %v1319_v50 = vpop.f32.mrb[5].mxu1 }
 0x447   : > { %v693_v51 = vpop.f32.mrb[6].mxu1  ;;  %v697_v52 = vsel %vm534_vm3, %v696_v49, -inf }
 0x448   : > { %698 = vmax.xlane.f32.xlu0 %v697_v52  ;;  %v1320_v53 = vpop.f32.mrb[7].mxu1 }
 0x44d   : > { %v810_v54 = vpop.f32.mrb[8].mxu1 }
 0x44e   : > { %v1331_v55 = vpop.f32.mrb[9].mxu1  ;;  %v816_v1 = vsel %vm529_vm4, %v810_v54, -3.4028235e+38 }
 0x44f   : > { %v813_v56 = vpop.f32.mrb[10].mxu1  ;;  %v817_v2 = vsel %vm534_vm3, %v816_v1, -inf }
 0x450   : > { %v1332_v57 = vpop.f32.mrb[11].mxu1  ;;  %v1502_v56 = vld [vmem:[#allocation10] sm:$0xff]  }
 0x451   : > { %592 = vrot.lane.b32.xlu1 %v2183_v26, %s1834_s13  ;;  %1352 = vmatpush3.bf16.msra.mxu1 %v1502_v56  ;;  %s1070_s13 = scalar_lea.sflag [#allocation6], %s2144_s1 }
 0x452   : > { %1353 = vmatprep.subr.bf16.mxu1 %v1825_v8 }
 0x455   : > { %v930_v58 = vpop.f32.mrb[12].mxu1 }
 0x456   : > { %v936_v59 = vsel %vm529_vm4, %v930_v58, -3.4028235e+38  ;;  %v1343_v60 = vpop.f32.mrb[13].mxu1 }
 0x457   : > { %v933_v61 = vpop.f32.mrb[14].mxu1  ;;  %v937_v62 = vsel %vm534_vm3, %v936_v59, -inf }
 0x458   : > { %938 = vmax.xlane.f32.xlu0 %v937_v62  ;;  %v1344_v63 = vpop.f32.mrb[15].mxu1  ;;  %v1503_v61 = vld [vmem:[#allocation10 + $0x8] sm:$0xff]  }
 0x459   : > { %1354 = vmatpush3.bf16.msra.mxu1 %v1503_v61 }
 0x46e   : > { %707 = vrot.lane.b32.xlu0 %v2183_v26, %s1835_s22  ;;  %s1841_s22 = smov [#allocation16]  }
 0x475   : > { %818 = vmax.xlane.f32.xlu1 %v817_v2 }
 0x486   : > { %827 = vrot.lane.b32.xlu1 %v2183_v26, %s1836_s11  ;;  %s1724_s11 = sshll.u32 %s1841_s22, 4  ;;  %s1725_s11 = int_to_ptr.vmem [resolvable:$false] %s1724_s11 }
 0x487   : > { %p1727_p0 = scmp.lt.s32.totalorder %s2258_s20, %s1725_s11 }
 0x48a   : > { %947 = vrot.lane.b32.xlu1 %v2183_v26, %s1837_s19  ;;  %s1726_s19 = scalar_lea.vmem %s1725_s11, 256 }
 0x48b   : > { %p1728_p7 = scmp.lt.s32.totalorder %s1726_s19, %s1720_s27 }
 0x48d   : > { %p1729_p5 = por %p1728_p7, %p1727_p0 }
 0x48f   : > { %p1730_p8 = pnand %p1729_p5, %p1723_p1 }
 0x4cd   : > { %v584_v3 = vpop.xlane.xlu1 %583 }
 0x4ce   : > { %v585_v4 = vsub.f32 %v581_v43, %v584_v3 }
 0x4d0   : > { %v586_v5 = vmul.f32 1.442695, %v585_v4 }
 0x4d1   : > { %v593_v6 = vpop.permute.xlu1 %592 }
 0x4d2   : > { %1506 = vpow2.f32 %v586_v5  ;;  %v599_v7 = vsel %vm597_vm5, %v593_v6, 0 }
 0x4d3   : > { %1310 = vmatpush3.bf16.msra.mxu0 %v599_v7 }
 0x4d4   : > { %1321 = vmatprep.subr.bf16.mxu0 %v1825_v8 }
 0x4d5   : > { %v699_v9 = vpop.xlane.xlu0 %698 }
 0x4d6   : > { %v700_v10 = vsub.f32 %v696_v49, %v699_v9 }
 0x4d8   : > { %v701_v11 = vmul.f32 1.442695, %v700_v10 }
 0x4da   : > { %1508 = vpow2.f32 %v701_v11 }
 0x4dc   : > { %v1507_v12 = vpop.eup %1506 }
 0x4dd   : > { %v591_v13 = vpack.c.bf16 %v1507_v12, %v1507_v12  ;;  %v588_v24 = vsel %vm534_vm3, %v1507_v12, 0.0 }
 0x4df   : > { %1312 = vmatmul.mubr.msk.bf16.vlgmr.msra.gmra.mrb[4].mxu0 %vm534_vm3, %v591_v13 }
 0x4e0   : > { %1323 = vmatprep.mubr.msk.bf16.mxu0 %vm1826_vm1, %v1825_v8 }
 0x4e4   : > { %v1509_v14 = vpop.eup %1508 }
 0x4e5   : > { %v939_v15 = vpop.xlane.xlu0 %938  ;;  %v703_v16 = vsel %vm534_vm3, %v1509_v14, 0.0  ;;  %v706_v21 = vpack.c.bf16 %v1509_v14, %v1509_v14 }
 0x4e6   : > { %v940_v17 = vsub.f32 %v936_v59, %v939_v15  ;;  %704 = vadd.xlane.f32.xlu0 %v703_v16  ;;  %v1247_v59 = vld [vmem:[#allocation12] ss:$0 sm:$0xff] }
 0x4e8   : > { %v941_v18 = vmul.f32 1.442695, %v940_v17 }
 0x4e9   : > { %v708_v19 = vpop.permute.xlu0 %707 }
 0x4ea   : > { %1510 = vpow2.f32 %v941_v18  ;;  %v713_v20 = vsel %vm597_vm5, %v708_v19, 0 }
 0x4eb   : > { %1322 = vmatpush3.bf16.msra.mxu0 %v713_v20 }
 0x4ec   : > { %1333 = vmatprep.subr.bf16.mxu0 %v1825_v8 }
 0x4ee   : > { %1324 = vmatmul.mubr.msk.bf16.vlgmr.msra.gmra.mrb[8].mxu0 %vm534_vm3, %v706_v21 }
 0x4ef   : > { %1335 = vmatprep.mubr.msk.bf16.mxu0 %vm1826_vm1, %v1825_v8 }
 0x4f4   : > { %v1511_v22 = vpop.eup %1510 }
 0x4f5   : > { %v943_v23 = vsel %vm534_vm3, %v1511_v22, 0.0  ;;  %v946_v35 = vpack.c.bf16 %v1511_v22, %v1511_v22 }
 0x4f6   : > { %944 = vadd.xlane.f32.xlu0 %v943_v23 }
 0x4fa   : > { %589 = vadd.xlane.f32.xlu0 %v588_v24 }
 0x502   : > { %v819_v25 = vpop.xlane.xlu1 %818 }
 0x503   : > { %v820_v26 = vsub.f32 %v816_v1, %v819_v25  ;;  %v455_v1 = vadd.f32 %v1247_v59, %v2166_v0 }
 0x505   : > { %v821_v27 = vmul.f32 1.442695, %v820_v26  ;;  %456 = vst.msk [vmem:[%s407_s8] sm:$0xff] %vm414_vm0, %v455_v1 }
 0x506   : > { %v828_v28 = vpop.permute.xlu1 %827 }
 0x507   : > { %1512 = vpow2.f32 %v821_v27  ;;  %v833_v29 = vsel %vm597_vm5, %v828_v28, 0 }
 0x508   : > { %1334 = vmatpush3.bf16.msra.mxu0 %v833_v29 }
 0x509   : > { %1345 = vmatprep.subr.bf16.mxu0 %v1825_v8 }
 0x50a   : > { %v948_v31 = vpop.permute.xlu1 %947 }
 0x50b   : > { %v953_v34 = vsel %vm597_vm5, %v948_v31, 0 }
 0x50c   : > { %v1006_v12 = vld [vmem:[%s407_s8] sm:$0xff] }
 0x511   : > { %v1513_v30 = vpop.eup %1512 }
 0x512   : > { %v823_v32 = vsel %vm534_vm3, %v1513_v30, 0.0  ;;  %v826_v33 = vpack.c.bf16 %v1513_v30, %v1513_v30 }
 0x513   : > { %824 = vadd.xlane.f32.xlu1 %v823_v32 }
 0x514   : > { %1336 = vmatmul.mubr.msk.bf16.vlgmr.msra.gmra.mrb[12].mxu0 %vm534_vm3, %v826_v33 }
 0x515   : > { %1346 = vmatpush3.bf16.msra.mxu0 %v953_v34  ;;  %1347 = vmatprep.mubr.msk.bf16.mxu0 %vm1826_vm1, %v1825_v8 }
 0x51c   : > { %1348 = vmatmul.mubr.msk.bf16.vlgmr.msra.gmra.mrb[16].mxu0 %vm534_vm3, %v946_v35 }
 0x573   : > { %v705_v36 = vpop.xlane.xlu0 %704 }
 0x583   : > { %v945_v37 = vpop.xlane.xlu0 %944 }
 0x587   : > { %v590_v38 = vpop.xlane.xlu0 %589 }
 0x588   : > { %1514 = vrcp.f32 %v590_v38 }
 0x589   : > { %1516 = vrcp.f32 %v705_v36 }
 0x592   : > { %v1515_v39 = vpop.eup %1514 }
 0x593   : > { %v1517_v46 = vpop.eup %1516 }
 0x5a0   : > { %v825_v53 = vpop.xlane.xlu1 %824 }
 0x5a1   : > { %1518 = vrcp.f32 %v825_v53 }
 0x5a2   : > { %1520 = vrcp.f32 %v945_v37 }
 0x5ab   : > { %v1519_v54 = vpop.eup %1518 }
 0x5ac   : > { %v1521_v2 = vpop.eup %1520 }
 0x5b2   : > { %v635_v40 = vpop.f32.mrb[4].mxu0 }
 0x5b3   : > { %v642_v41 = vmul.f32 %v1515_v39, %v635_v40  ;;  %v1313_v42 = vpop.f32.mrb[5].mxu0 }
 0x5b4   : > { %v638_v43 = vpop.f32.mrb[6].mxu0 }
 0x5b5   : > { %v643_v44 = vpack.c.bf16 %v642_v41, %v642_v41  ;;  %v1314_v45 = vpop.f32.mrb[7].mxu0 }
 0x5b7   : > { %645 = vst.msk [vmem:[#allocation3] sm:$0xf] %vm644_vm6, %v643_v44 }
 0x5c1   : > { %v749_v47 = vpop.f32.mrb[8].mxu0 }
 0x5c2   : > { %v756_v48 = vmul.f32 %v1517_v46, %v749_v47  ;;  %v1325_v49 = vpop.f32.mrb[9].mxu0 }
 0x5c3   : > { %v752_v50 = vpop.f32.mrb[10].mxu0 }
 0x5c4   : > { %v1270_v51 = vpack.c.bf16 %v756_v48, %v756_v48  ;;  %v1326_v52 = vpop.f32.mrb[11].mxu0 }
 0x5c6   : > { %761 = vrot.lane.b32.xlu1 %v1270_v51, %s1838_s14 }
 0x5e7   : > { %v869_v55 = vpop.f32.mrb[12].mxu0 }
 0x5e8   : > { %v876_v57 = vmul.f32 %v1519_v54, %v869_v55  ;;  %v1337_v58 = vpop.f32.mrb[13].mxu0 }
 0x5e9   : > { %v872_v60 = vpop.f32.mrb[14].mxu0 }
 0x5ea   : > { %v1271_v62 = vpack.c.bf16 %v876_v57, %v876_v57  ;;  %v1338_v63 = vpop.f32.mrb[15].mxu0 }
 0x5ec   : > { %881 = vrot.lane.b32.xlu0 %v1271_v62, %s1839_s30 }
 0x5ef   : > { %v989_v3 = vpop.f32.mrb[16].mxu0 }
 0x5f0   : > { %v996_v4 = vmul.f32 %v1521_v2, %v989_v3  ;;  %v1349_v5 = vpop.f32.mrb[17].mxu0 }
 0x5f1   : > { %v992_v6 = vpop.f32.mrb[18].mxu0 }
 0x5f2   : > { %v1272_v7 = vpack.c.bf16 %v996_v4, %v996_v4  ;;  %v1350_v9 = vpop.f32.mrb[19].mxu0 }
 0x5f4   : > { %1001 = vrot.lane.b32.xlu1 %v1272_v7, %s1840_s9 }
 0x638   : > { %v762_v8 = vpop.permute.xlu1 %761 }
 0x639   : > { %765 = vst.msk [vmem:[#allocation3] sm:$0xf] %vm764_vm7, %v762_v8 }
 0x65e   : > { %v882_v0 = vpop.permute.xlu0 %881 }
 0x65f   : > { %885 = vst.msk [vmem:[#allocation3] sm:$0xf] %vm884_vm8, %v882_v0 }
 0x666   : > { %v1002_v10 = vpop.permute.xlu1 %1001 }
 0x667   : > { %1005 = vst.msk [vmem:[#allocation3] sm:$0xf] %vm1004_vm9, %v1002_v10 }
 0x66e   : > { %v1007_v11 = vld [vmem:[#allocation3] sm:$0xf] }
 0x66f   : > { %1356 = vmatmul.mubr.msk.bf16.vlgmr.msra.gmra.mrb[16].mxu1 %vm414_vm0, %v1007_v11 }
 0x742   : > { %v1061_v13 = vpop.f32.mrb[16].mxu1 }
 0x743   : > { %v1067_v14 = vadd.f32 %v1061_v13, %v1006_v12  ;;  %v1357_v15 = vpop.f32.mrb[17].mxu1 }
 0x744   : > { %v1064_v16 = vpop.f32.mrb[18].mxu1 }
 0x745   : > { %1068 = vst.msk [vmem:[%s407_s8] sm:$0xff] %vm414_vm0, %v1067_v14  ;;  %v1358_v17 = vpop.f32.mrb[19].mxu1 }
 0x746   : > { %1733 = shalt.err (!%p1730_p8)
}
 0x747   : > { %s1734_s1 = scalar_lea.hbm %s2256_s18, 128  ;;  %s1738_s8 = scalar_lea.hbm %s2336_s7, 256 }
 0x748   : > { %p1735_p3 = scmp.ne.s32.totalorder %s2256_s18, %s1734_s1  ;;  %p1739_p13 = scmp.lt.u32.totalorder %s2256_s18, %s2336_s7 }
 0x749   : > { %p1740_p12 = scmp.lt.u32.totalorder %s1738_s8, %s1734_s1  ;;  %p1742_p2 = scmp.lt.u32.totalorder %s1734_s1, %s2256_s18 }
 0x74a   : > { %p1736_p11 = pnand %p1735_p3, %p2337_p9 }
 0x74b   : > { %p1741_p4 = por %p1740_p12, %p1739_p13 }
 0x74c   : > { %p1737_p6 = pneg %p1736_p11 }
 0x74d   : > { %p1743_p10 = por %p1742_p2, %p1741_p4 }
 0x74f   : > { %p1744_p1 = pnand %p1743_p10, %p1737_p6 }
 0x751   : > { %1747 = shalt.err (!%p1744_p1)
}
 0x752   : > { %1385 = dma.vmem_to_hbm [thread:$0]  (%p2337_p9), %s2258_s20, 128, %s2256_s18, %s1070_s13  }
 0x753 PF: > { %s1095_s16 = sand.u32 1, %s1794_s24   ;;  %p2338_p0 = scmp.ne.s32.totalorder %s2332_s10, 0 }
 0x754   : > { %p2339_p7 = scmp.ge.s32.totalorder %s1814_s29, 2  ;;  %s1096_s12 = scalar_lea.sflag [#allocation6], %s1095_s16 }
 0x756   : > { %p1411_p5 = pnand %p2339_p7, %p2338_p0 }
 0x758   : > { %1789 = dma.done.wait (!%p1411_p5), %s1096_s12, 128  }
 0x759   : > { %1791 = vsyncadd (!%p1411_p5), %s1096_s12, 4294967168  ;;  %s26_s29 = sadd.s32 1, %s1814_s29   ;;  %s2340_s24 = smov %s1798_s25 }
 0x75a   : > { %p23_p8 = scmp.ge.s32.totalorder %s26_s29, 4   ;;  %s2341_s25 = smov %s1802_s26 }
 0x75b   : > { %s2342_s26 = smov %s2094_s23  ;;  %s2343_s27 = smov %s1810_s28 }
 0x75c   : > { %s2344_s28 = smov %s2346_s15  ;;  %25 = sbr.rel (!%p23_p8) target bundleno = 12 (0xc), region = 124 }
 0x763   :  { %1101 = vsyncpa [#allocation5], 1 }
 0x764   :  { %1103 = vsyncpa [#allocation5 + $0x1], 1 }
 0x765   :  { %1104 = vsyncpa [#allocation8], 1 }
 0x766   :  { %1105 = vsyncpa [#allocation11], 1 }
 0x767   :  { %1106 = vsyncpa [#allocation14], 1 }
 0x768   :  { %1107 = vsyncpa [#allocation6], 1 }
 0x769   :  { %1109 = vsyncpa [#allocation6 + $0x1], 1 }

</bundles_post_ra>
